<compile_context>
chip_gen: v7x
topology: tpu7x:2x2x1
jax: 0.10.0
libtpu: 0.0.40
codegen_flags: <defaults>
</compile_context>

<pallas_src>
import functools

import jax
import jax.numpy as jnp
from jax.experimental import pallas as pl
from jax.experimental.pallas import tpu as pltpu


def _round_up(x, m):
    return ((x + m - 1) // m) * m


# -----------------------------------------------------------------------------
# Single-step kernel: computes next_state only (expectation / delta are pure
# slices of the inputs and are produced by the wrapper).
# -----------------------------------------------------------------------------
def _cell_step_kernel(n_obs, n_obs_pad, n_hid, teacher_forcing, *refs):
    if teacher_forcing:
        state_ref, obs_ref, a_wt_ref, next_ref = refs
    else:
        state_ref, a_wt_ref, next_ref = refs

    state = state_ref[...].astype(jnp.float32)                     # (B, H)

    if teacher_forcing:
        head = state[:, :n_obs_pad]                                 # (B, P)
        if n_obs < n_obs_pad:
            lane = jax.lax.broadcasted_iota(jnp.int32, head.shape, 1)
            expect_head = jnp.where(lane < n_obs, head, 0.0)
        else:
            expect_head = head
        # obs_ref is zero-padded past n_obs (wrapper contract), and
        # expect_head is zero there too, so delta_head is already the
        # zero-padded `delta @ ConMat`.
        delta_head = obs_ref[...].astype(jnp.float32) - expect_head
        r_head = head - delta_head
        if n_obs_pad < n_hid:
            r_state = jnp.concatenate([r_head, state[:, n_obs_pad:]], axis=1)
        else:
            r_state = r_head
    else:
        r_state = state                                             # Ide @ state

    # next_state = tanh(r_state) @ A.weight.T ; weight arrives pre-transposed
    # to (in, out), so contraction is the plain (((1,),(0,))) layout.
    a_wt = a_wt_ref[...]
    nxt = jax.lax.dot_general(
        jnp.tanh(r_state).astype(a_wt.dtype), a_wt,
        (((1,), (0,)), ((), ())), preferred_element_type=jnp.float32)
    next_ref[...] = nxt.astype(next_ref.dtype)


def vanilla_cell_forward(state, a_weight, n_obs, teacher_forcing,
                         observation=None, *, weight_dtype=jnp.float32):
    """JAX/Pallas equivalent of vanilla_cell.forward (single step).

    state:       (n_hid,) or (B, n_hid) f32
    a_weight:    (n_hid, n_hid) f32 -- torch nn.Linear weight, (out, in) layout
    observation: (n_obs,) or (B, n_obs), required when teacher_forcing=True
    Returns (expectation, next_state, delta_or_None), matching the input rank.
    """
    teacher_forcing = bool(teacher_forcing)
    if teacher_forcing and observation is None:
        raise ValueError(
            "`observation` must be provided when `teacher_forcing` is True.")

    squeeze = state.ndim == 1
    s2 = (state[None, :] if squeeze else state).astype(jnp.float32)
    b, n_hid = s2.shape
    n_obs_pad = min(_round_up(n_obs, 128), n_hid)

    # One-time weight prep: (out, in) -> (in, out), optional bf16 cast.
    a_wt = jnp.asarray(a_weight).astype(weight_dtype).T

    inputs = [s2]
    in_specs = [pl.BlockSpec((b, n_hid), lambda: (0, 0))]
    obs2 = None
    if teacher_forcing:
        obs2 = (observation[None, :] if observation.ndim == 1
                else observation).astype(jnp.float32)
        obs_pad = jnp.pad(obs2, ((0, 0), (0, n_obs_pad - n_obs)))
        inputs.append(obs_pad)
        in_specs.append(pl.BlockSpec((b, n_obs_pad), lambda: (0, 0)))
    inputs.append(a_wt)
    in_specs.append(pl.BlockSpec((n_hid, n_hid), lambda: (0, 0)))

    kernel = functools.partial(
        _cell_step_kernel, n_obs, n_obs_pad, n_hid, teacher_forcing)
    next_state = pl.pallas_call(
        kernel,
        out_shape=jax.ShapeDtypeStruct((b, n_hid), jnp.float32),
        in_specs=in_specs,
        out_specs=pl.BlockSpec((b, n_hid), lambda: (0, 0)),
    )(*inputs)

    # expectation = state @ eye(n_obs, n_hid).T == first n_obs lanes of state;
    # delta = observation - expectation.  Pure layout plumbing in the wrapper.
    expectation = s2[:, :n_obs]
    delta = (obs2[:, :n_obs] - expectation) if teacher_forcing else None
    if squeeze:
        expectation = expectation[0]
        next_state = next_state[0]
        delta = delta[0] if delta is not None else None
    # TODO(synk): torch's `print('expectation requires_grad:', ...)` (autograd
    # metadata print) has no Pallas equivalent and is omitted.
    return expectation, next_state, delta


# -----------------------------------------------------------------------------
# Fused multi-step rollout: T cell steps in one pallas_call.  Each grid step
# processes `tt` timesteps with an unrolled inner loop; the HxH weight is
# VMEM-resident (constant index_map) and the state is carried in VMEM scratch.
# Only the state sequence is written back; expectation/delta are reconstructed
# in the wrapper.
# -----------------------------------------------------------------------------
def _cell_rollout_kernel(n_obs, n_obs_pad, n_hid, tt, teacher_forcing, *refs):
    if teacher_forcing:
        state0_ref, obs_ref, a_wt_ref, states_ref, state_scr = refs
    else:
        state0_ref, a_wt_ref, states_ref, state_scr = refs

    @pl.when(pl.program_id(0) == 0)
    def _():
        state_scr[...] = state0_ref[...].astype(jnp.float32)

    a_wt = a_wt_ref[...]                           # resident (in, out) weight
    b = state_scr.shape[0]

    # Hoisted, loop-invariant obs-lane mask (skipped when n_obs % 128 == 0).
    if teacher_forcing and n_obs < n_obs_pad:
        lane = jax.lax.broadcasted_iota(jnp.int32, (b, n_obs_pad), 1)
        obs_mask = lane < n_obs
    else:
        obs_mask = None

    def body(i, carry):
        state = state_scr[...]                                      # (B, H)
        if teacher_forcing:
            head = state[:, :n_obs_pad]
            expect_head = (jnp.where(obs_mask, head, 0.0)
                           if obs_mask is not None else head)
            delta_head = obs_ref[i].astype(jnp.float32) - expect_head
            r_head = head - delta_head
            if n_obs_pad < n_hid:
                r_state = jnp.concatenate(
                    [r_head, state[:, n_obs_pad:]], axis=1)
            else:
                r_state = r_head
        else:
            r_state = state
        nxt = jax.lax.dot_general(
            jnp.tanh(r_state).astype(a_wt.dtype), a_wt,
            (((1,), (0,)), ((), ())), preferred_element_type=jnp.float32)
        states_ref[i] = nxt.astype(states_ref.dtype)
        state_scr[...] = nxt                                         # carry
        return carry

    jax.lax.fori_loop(0, tt, body, 0, unroll=True)


def vanilla_cell_rollout(state0, a_weight, n_obs, num_steps, teacher_forcing,
                         observations=None, *, steps_per_block=8,
                         weight_dtype=jnp.float32):
    """Run `num_steps` vanilla_cell steps in a single fused Pallas kernel.

    state0:       (n_hid,) or (B, n_hid)
    observations: (T, n_obs) or (T, B, n_obs) when teacher_forcing=True
    Returns (expectations, states, deltas_or_None), each with leading dim T.
    """
    teacher_forcing = bool(teacher_forcing)
    if teacher_forcing and observations is None:
        raise ValueError(
            "`observations` must be provided when `teacher_forcing` is True.")

    squeeze = state0.ndim == 1
    s0 = (state0[None, :] if squeeze else state0).astype(jnp.float32)
    b, n_hid = s0.shape
    T = int(num_steps)
    n_obs_pad = min(_round_up(n_obs, 128), n_hid)

    tt = max(1, min(int(steps_per_block), T))
    n_blocks = pl.cdiv(T, tt)
    t_pad = n_blocks * tt                      # pad T up to a chunk multiple

    a_wt = jnp.asarray(a_weight).astype(weight_dtype).T   # once, (in, out)

    inputs = [s0]
    in_specs = [pl.BlockSpec((b, n_hid), lambda t: (0, 0))]
    obs = None
    if teacher_forcing:
        obs = observations
        if obs.ndim == 2:
            obs = obs[:, None, :]
        obs = obs.astype(jnp.float32)                      # (T, B, n_obs)
        obs_pad = jnp.pad(
            obs, ((0, t_pad - T), (0, 0), (0, n_obs_pad - n_obs)))
        inputs.append(obs_pad)
        in_specs.append(pl.BlockSpec((tt, b, n_obs_pad), lambda t: (t, 0, 0)))
    inputs.append(a_wt)
    # Constant index_map -> weight DMA'd once, stays resident in VMEM for all T.
    in_specs.append(pl.BlockSpec((n_hid, n_hid), lambda t: (0, 0)))

    kernel = functools.partial(
        _cell_rollout_kernel, n_obs, n_obs_pad, n_hid, tt, teacher_forcing)
    states = pl.pallas_call(
        kernel,
        grid=(n_blocks,),
        out_shape=jax.ShapeDtypeStruct((t_pad, b, n_hid), jnp.float32),
        in_specs=in_specs,
        out_specs=pl.BlockSpec((tt, b, n_hid), lambda t: (t, 0, 0)),
        scratch_shapes=[pltpu.VMEM((b, n_hid), jnp.float32)],
        compiler_params=pltpu.CompilerParams(
            dimension_semantics=("arbitrary",)),
    )(*inputs)
    states = states[:T]

    # Reconstruct expectation / delta outside the kernel (removes 2 of the 3
    # per-step output DMA streams).  expectation[t] is the first n_obs lanes
    # of the state the cell saw at step t.
    prev_states = jnp.concatenate([s0[None], states[:-1]], axis=0)
    expectations = prev_states[:, :, :n_obs]
    deltas = (obs - expectations) if teacher_forcing else None

    if squeeze:
        expectations = expectations[:, 0]
        states = states[:, 0]
        deltas = deltas[:, 0] if deltas is not None else None
    return expectations, states, deltas


# -----------------------------------------------------------------------------
# Pure-JAX reference mirroring the PyTorch code exactly (identity matmuls),
# at highest matmul precision so the comparison is against true f32 math.
# -----------------------------------------------------------------------------
def _reference_forward(state, a_weight, n_obs, teacher_forcing,
                       observation=None):
    n_hid = state.shape[-1]
    hp = jax.lax.Precision.HIGHEST
    conmat = jnp.eye(n_obs, n_hid, dtype=jnp.float32)
    ide = jnp.eye(n_hid, dtype=jnp.float32)
    expectation = jnp.matmul(state, conmat.T, precision=hp)
    if teacher_forcing:
        delta = observation - expectation
        teach_forc = jnp.matmul(delta, conmat, precision=hp)
        r_state = state - teach_forc
        next_state = jnp.matmul(jnp.tanh(r_state), a_weight.T, precision=hp)
        return expectation, next_state, delta
    r_state = jnp.matmul(state, ide, precision=hp)        # == Ide @ state
    next_state = jnp.matmul(jnp.tanh(r_state), a_weight.T, precision=hp)
    return expectation, next_state, None


if __name__ == "__main__":
    n_obs = 32
    n_hid = 128
    batch = 8
    steps = 8

    key = jax.random.PRNGKey(0)
    k_w, k_s, k_o, k_sb, k_ob, k_w2, k_sb2, k_ob2 = jax.random.split(key, 8)

    # CustomLinear(n_hid, n_hid, bias=False) with uniform init in (-0.75, 0.75).
    a_weight = jax.random.uniform(k_w, (n_hid, n_hid), jnp.float32,
                                  minval=-0.75, maxval=0.75)
    state = jax.random.uniform(k_s, (n_hid,), jnp.float32, -1.0, 1.0)
    observation = jax.random.uniform(k_o, (n_obs,), jnp.float32, -1.0, 1.0)
    state_b = jax.random.uniform(k_sb, (batch, n_hid), jnp.float32, -1.0, 1.0)
    obs_seq = jax.random.uniform(k_ob, (steps, batch, n_obs), jnp.float32,
                                 -1.0, 1.0)

    def close(a, b, tol):
        return bool(jnp.allclose(a, b, atol=tol, rtol=tol))

    ok = True

    # 1) Single step, teacher forcing, vector state, vs pure-JAX reference.
    exp1, nxt1, d1 = vanilla_cell_forward(state, a_weight, n_obs, True,
                                          observation)
    jax.block_until_ready(nxt1)
    re1, rn1, rd1 = _reference_forward(state, a_weight, n_obs, True,
                                       observation)
    ok &= close(exp1, re1, 1e-3) and close(nxt1, rn1, 1e-3) and close(d1, rd1, 1e-3)

    # 2) Single step, free running (no obs input, no delta).
    exp2, nxt2, d2 = vanilla_cell_forward(state, a_weight, n_obs, False)
    jax.block_until_ready(nxt2)
    re2, rn2, _ = _reference_forward(state, a_weight, n_obs, False)
    ok &= close(exp2, re2, 1e-3) and close(nxt2, rn2, 1e-3) and (d2 is None)

    # 3) Batched single step vs reference.
    exp3, nxt3, d3 = vanilla_cell_forward(state_b, a_weight, n_obs, True,
                                          obs_seq[0])
    jax.block_until_ready(nxt3)
    re3, rn3, rd3 = _reference_forward(state_b, a_weight, n_obs, True,
                                       obs_seq[0])
    ok &= close(exp3, re3, 1e-3) and close(nxt3, rn3, 1e-3) and close(d3, rd3, 1e-3)

    # 4) Fused, chunked rollout (teacher forcing) vs the single-step kernel
    #    iterated in Python (same per-step math; Python loop is for testing
    #    only -- production should always use the rollout).
    exp_seq, st_seq, d_seq = vanilla_cell_rollout(
        state_b, a_weight, n_obs, steps, True, obs_seq, steps_per_block=4)
    jax.block_until_ready(st_seq)
    s_cur = state_b
    for t in range(steps):
        e_t, n_t, dt_t = vanilla_cell_forward(s_cur, a_weight, n_obs, True,
                                              obs_seq[t])
        ok &= close(exp_seq[t], e_t, 1e-3)
        ok &= close(st_seq[t], n_t, 1e-3)
        ok &= close(d_seq[t], dt_t, 1e-3)
        s_cur = n_t

    # 5) Fused rollout, free running.
    exp_seq2, st_seq2, d_seq2 = vanilla_cell_rollout(
        state_b, a_weight, n_obs, steps, False, steps_per_block=8)
    jax.block_until_ready(st_seq2)
    s_cur = state_b
    for t in range(steps):
        e_t, n_t, _ = vanilla_cell_forward(s_cur, a_weight, n_obs, False)
        ok &= close(exp_seq2[t], e_t, 1e-3)
        ok &= close(st_seq2[t], n_t, 1e-3)
        s_cur = n_t
    ok &= d_seq2 is None

    # 6) Larger hidden dim: exercises n_obs_pad < n_hid (lane concat path) and
    #    a padded final time-chunk (T not a multiple of steps_per_block).
    n_hid2, steps2 = 256, 6
    a_weight2 = jax.random.uniform(k_w2, (n_hid2, n_hid2), jnp.float32,
                                   minval=-0.2, maxval=0.2)
    state_b2 = jax.random.uniform(k_sb2, (batch, n_hid2), jnp.float32, -1., 1.)
    obs_seq2 = jax.random.uniform(k_ob2, (steps2, batch, n_obs), jnp.float32,
                                  -1., 1.)
    exp_s, st_s, d_s = vanilla_cell_rollout(
        state_b2, a_weight2, n_obs, steps2, True, obs_seq2, steps_per_block=4)
    jax.block_until_ready(st_s)
    s_cur = state_b2
    for t in range(steps2):
        e_t, n_t, dt_t = vanilla_cell_forward(s_cur, a_weight2, n_obs, True,
                                              obs_seq2[t])
        ok &= close(exp_s[t], e_t, 1e-3)
        ok &= close(st_s[t], n_t, 1e-3)
        ok &= close(d_s[t], dt_t, 1e-3)
        s_cur = n_t

    # 7) bf16 weight path (halves weight DMA / MXU passes), loose tolerance.
    _, nxt_bf, _ = vanilla_cell_forward(state_b2, a_weight2, n_obs, True,
                                        obs_seq2[0],
                                        weight_dtype=jnp.bfloat16)
    jax.block_until_ready(nxt_bf)
    _, rn_bf, _ = _reference_forward(state_b2, a_weight2, n_obs, True,
                                     obs_seq2[0])
    ok &= close(nxt_bf, rn_bf, 1e-1)

    print("KERNEL_OK" if ok else "KERNEL_MISMATCH")
</pallas_src>

<mosaic_0001>
module attributes {stable_mosaic.version = 11 : i64} {
  func.func @_cell_step_kernel(%arg0: memref<1x128xf32, #tpu.memory_space<vmem>>, %arg1: memref<1x128xf32, #tpu.memory_space<vmem>>, %arg2: memref<128x128xf32, #tpu.memory_space<vmem>>, %arg3: memref<1x128xf32, #tpu.memory_space<vmem>>) attributes {dimension_semantics = [], scalar_prefetch = 0 : i64, scratch_operands = 0 : i64, tpu.core_type = #tpu.core_type<tc>} {
    %c0 = arith.constant 0 : index
    %c0_0 = arith.constant 0 : index
    %0 = vector.load %arg0[%c0, %c0_0] : memref<1x128xf32, #tpu.memory_space<vmem>>, vector<1x128xf32>
    %1 = tpu.iota {dimensions = array<i32: 1>} : vector<1x128xi32>
    %c32_i32 = arith.constant 32 : i32
    %2 = vector.broadcast %c32_i32 : i32 to vector<1x128xi32>
    %3 = arith.cmpi slt, %1, %2 : vector<1x128xi32>
    %cst = arith.constant 0.000000e+00 : f32
    %4 = vector.broadcast %cst : f32 to vector<1x128xf32>
    %5 = arith.select %3, %0, %4 : vector<1x128xi1>, vector<1x128xf32>
    %c0_1 = arith.constant 0 : index
    %c0_2 = arith.constant 0 : index
    %6 = vector.load %arg1[%c0_1, %c0_2] : memref<1x128xf32, #tpu.memory_space<vmem>>, vector<1x128xf32>
    %7 = arith.subf %6, %5 : vector<1x128xf32>
    %8 = arith.subf %0, %7 : vector<1x128xf32>
    %c0_3 = arith.constant 0 : index
    %c0_4 = arith.constant 0 : index
    %9 = vector.load %arg2[%c0_3, %c0_4] : memref<128x128xf32, #tpu.memory_space<vmem>>, vector<128x128xf32>
    %10 = math.tanh %8 : vector<1x128xf32>
    %cst_5 = arith.constant dense<0.000000e+00> : vector<1x128xf32>
    %11 = tpu.matmul %10, %9, %cst_5 {dimension_numbers = #tpu.dot_dimension_numbers<[1], [0], [0], [1], [0, 0, 1, 1], [], []>} : vector<1x128xf32>, vector<128x128xf32>, vector<1x128xf32> -> vector<1x128xf32>
    %c0_6 = arith.constant 0 : index
    %c0_7 = arith.constant 0 : index
    %12 = vector.load %arg3[%c0_6, %c0_7] : memref<1x128xf32, #tpu.memory_space<vmem>>, vector<1x128xf32>
    tpu.vector_store %arg3[%c0_6, %c0_7], %11 {strides = array<i32>} : memref<1x128xf32, #tpu.memory_space<vmem>>, vector<1x128xf32>,
    return
  }
}

</mosaic_0001>

<bundles_post_ra>
// kernel: tpu_custom_call.1
= control target key start
LH: loop header
LB: loop body
LE: loop exit
PB: predicated region body
PF: predicated region fallthrough
CT: control target
= control target key end

     0   :  { %8 = vsyncpa [#allocation3], 0  ;;  %s385_s0 = inlined_call_operand.hbm [shape: f32[1,128], index: 0, kind: input, shape index: {}]   ;;  %s386_s1 = inlined_call_operand.vmem [shape: f32[1,128], index: 1, kind: input, shape index: {}]   ;;  %s387_s2 = inlined_call_operand.hbm [shape: f32[128,128], index: 2, kind: input, shape index: {}]   ;;  %s388_s3 = inlined_call_operand.hbm [shape: f32[1,128], index: 3, kind: output, shape index: {}]  }
   0x1   :  { %9 = vsyncpa [#allocation6], 0 }
   0x2   :  { %10 = vsyncpa [#allocation4], 0  ;;  %s311_s12 = smov [#allocation2]   ;;  %s312_s14 = smov [#allocation5]  }
   0x3   :  { %s17_s13 = sshll.u32 %s311_s12, 4  ;;  %s28_s15 = sshll.u32 %s312_s14, 4  ;;  %s18_s13 = int_to_ptr.vmem [resolvable:$true] %s17_s13  ;;  %s339_s15 = int_to_ptr.vmem [resolvable:$true] %s28_s15 }
   0x4   :  { %s239_s18 = scalar_lea.hbm %s385_s0, 16 }
   0x5   :  { %p240_p0 = scmp.ne.s32.totalorder %s385_s0, %s239_s18  ;;  %p243_p1 = scmp.lt.u32.totalorder %s239_s18, %s385_s0 }
   0x7   :  { %p245_p2 = pnand %p243_p1, %p240_p0 }
   0x9   :  { %248 = shalt.err (!%p245_p2)
}
   0xa   :  { %s249_s23 = scalar_lea.vmem %s18_s13, 16  ;;  %s253_s24 = scalar_lea.vmem %s18_s13, 32 }
   0xb   :  { %p250_p3 = scmp.ne.s32.totalorder %s18_s13, %s249_s23  ;;  %p254_p4 = scmp.lt.s32.totalorder %s18_s13, %s18_s13 }
   0xc   :  { %p255_p5 = scmp.lt.s32.totalorder %s253_s24, %s249_s23 }
   0xe   :  { %p256_p6 = por %p255_p5, %p254_p4 }
  0x10   :  { %p257_p7 = pnand %p256_p6, %p250_p3 }
  0x12   :  { %260 = shalt.err (!%p257_p7)
}
  0x13   :  { %20 = dma.hbm_to_vmem [thread:$0]  %s385_s0, 16, %s18_s13, [#allocation3]  }
  0x14   :  { %s261_s29 = scalar_lea.hbm %s387_s2, 2048 }
  0x15   :  { %p262_p8 = scmp.ne.s32.totalorder %s387_s2, %s261_s29  ;;  %p265_p9 = scmp.lt.u32.totalorder %s261_s29, %s387_s2 }
  0x17   :  { %p267_p10 = pnand %p265_p9, %p262_p8 }
  0x19   :  { %270 = shalt.err (!%p267_p10)
}
  0x1a   :  { %s271_s7 = scalar_lea.vmem %s339_s15, 2048  ;;  %p276_p12 = scmp.lt.s32.totalorder %s339_s15, %s339_s15 }
  0x1b   :  { %p272_p11 = scmp.ne.s32.totalorder %s339_s15, %s271_s7  ;;  %p277_p13 = scmp.lt.s32.totalorder %s271_s7, %s271_s7 }
  0x1d   :  { %p278_p0 = por %p277_p13, %p276_p12 }
  0x1f   :  { %p279_p1 = pnand %p278_p0, %p272_p11 }
  0x21   :  { %282 = shalt.err (!%p279_p1)
}
  0x22   :  { %s313_s0 = smov 128   ;;  %s314_s8 = smov 8  }
  0x23   :  { %34 = dma.hbm_to_vmem [thread:$0]  %s387_s2, 2048, %s339_s15, [#allocation6], %s313_s0, %s313_s0, %s314_s8  }
  0x24   :  { %305 = dma.done.wait [#allocation3], 16  }
  0x25   :  { %306 = vsyncadd [#allocation3], 4294967280 }
  0x26   :  { %307 = dma.done.wait [#allocation6], 2048  }
  0x27   :  { %308 = vsyncadd [#allocation6], 4294965248  ;;  %v315_v0 = vmov 0.0|0.0   ;;  %vm316_vm0 = vmmov 0   ;;  %v317_v1 = vmov 0.0   ;;  %v42_v2 = vlaneseq  ;;  %v49_v3 = vld [vmem:[#allocation5] sm:$0xff] }
  0x28   :  { %205 = vmatprep.subr.bf16.mxu0 %v315_v0  ;;  %202 = vmatprep.mubr.msk.f32.mxu0 %vm316_vm0, %v317_v1  ;;  %v50_v4 = vld [vmem:[#allocation5 + $0x8] sm:$0xff]  ;;  %v51_v5 = vld [vmem:[#allocation5 + $0x10] sm:$0xff]  ;;  %v52_v7 = vld [vmem:[#allocation5 + $0x18] sm:$0xff] }
  0x29   :  { %v206_v6 = vpack.c.bf16 %v50_v4, %v49_v3  ;;  %v209_v8 = vpack.c.bf16 %v52_v7, %v51_v5  ;;  %v43_v9 = vand.u32 127, %v42_v2  ;;  %v53_v10 = vld [vmem:[#allocation5 + $0x20] sm:$0xff]  ;;  %v54_v11 = vld [vmem:[#allocation5 + $0x28] sm:$0xff]  ;;  %v41_v13 = vld [vmem:[#allocation2] sm:$0x1] }
  0x2a   :  { %v212_v12 = vpack.c.bf16 %v54_v11, %v53_v10  ;;  %v55_v14 = vld [vmem:[#allocation5 + $0x30] sm:$0xff]  ;;  %v56_v15 = vld [vmem:[#allocation5 + $0x38] sm:$0xff]  ;;  %v57_v19 = vld [vmem:[#allocation5 + $0x40] sm:$0xff] }
  0x2b   :  { %207 = vmatpush3.bf16.msra.mxu0 %v206_v6  ;;  %vm44_vm1 = vcmp.lt.s32.totalorder %v43_v9, 32  ;;  %v46_v17 = vld [vmem:[%s386_s1] sm:$0x1]  ;;  %v215_v18 = vpack.c.bf16 %v56_v15, %v55_v14  ;;  %v58_v20 = vld [vmem:[#allocation5 + $0x48] sm:$0xff]  ;;  %v59_v23 = vld [vmem:[#allocation5 + $0x50] sm:$0xff]  ;;  %s318_s1 = smov [#allocation7]  }
  0x2c   :  { %208 = vmatprep.subr.bf16.mxu0 %v315_v0  ;;  %v45_v16 = vsel %vm44_vm1, %v41_v13, 0.0  ;;  %v218_v22 = vpack.c.bf16 %v58_v20, %v57_v19  ;;  %v60_v24 = vld [vmem:[#allocation5 + $0x58] sm:$0xff]  ;;  %v61_v27 = vld [vmem:[#allocation5 + $0x60] sm:$0xff]  ;;  %v62_v28 = vld [vmem:[#allocation5 + $0x68] sm:$0xff]  ;;  %s143_s12 = sshll.u32 %s318_s1, 4  ;;  %s144_s12 = int_to_ptr.vmem [resolvable:$true] %s143_s12 }
  0x2d   :  { %v47_v21 = vsub.f32 %v46_v17, %v45_v16  ;;  %v221_v26 = vpack.c.bf16 %v60_v24, %v59_v23  ;;  %v224_v29 = vpack.c.bf16 %v62_v28, %v61_v27  ;;  %v63_v30 = vld [vmem:[#allocation5 + $0x70] sm:$0xff]  ;;  %v64_v31 = vld [vmem:[#allocation5 + $0x78] sm:$0xff]  ;;  %s283_s13 = scalar_lea.vmem %s144_s12, 16  ;;  %s287_s14 = scalar_lea.vmem %s144_s12, 32 }
  0x2e   :  { %v227_v32 = vpack.c.bf16 %v64_v31, %v63_v30  ;;  %p284_p2 = scmp.ne.s32.totalorder %s144_s12, %s283_s13  ;;  %p288_p3 = scmp.lt.s32.totalorder %s144_s12, %s144_s12 }
  0x2f   :  { %210 = vmatpush3.bf16.msra.mxu0 %v209_v8  ;;  %v48_v25 = vsub.f32 %v41_v13, %v47_v21  ;;  %p289_p4 = scmp.lt.s32.totalorder %s287_s14, %s283_s13 }
  0x30   :  { %211 = vmatprep.subr.bf16.mxu0 %v315_v0 }
  0x31   :  { %237 = vtanh.f32 %v48_v25  ;;  %p290_p5 = por %p289_p4, %p288_p3 }
  0x33   :  { %213 = vmatpush3.bf16.msra.mxu0 %v212_v12  ;;  %p291_p6 = pnand %p290_p5, %p284_p2 }
  0x34   :  { %214 = vmatprep.subr.bf16.mxu0 %v315_v0 }
  0x37   :  { %216 = vmatpush3.bf16.msra.mxu0 %v215_v18 }
  0x38   :  { %217 = vmatprep.subr.bf16.mxu0 %v315_v0 }
  0x3b   :  { %219 = vmatpush3.bf16.msra.mxu0 %v218_v22  ;;  %v238_v33 = vpop.eup %237 }
  0x3c   :  { %220 = vmatprep.subr.bf16.mxu0 %v315_v0 }
  0x3f   :  { %222 = vmatpush3.bf16.msra.mxu0 %v221_v26 }
  0x40   :  { %223 = vmatprep.subr.bf16.mxu0 %v315_v0 }
  0x43   :  { %225 = vmatpush3.bf16.msra.mxu0 %v224_v29 }
  0x44   :  { %226 = vmatprep.subr.bf16.mxu0 %v315_v0 }
  0x47   :  { %228 = vmatpush3.bf16.msra.mxu0 %v227_v32 }
  0x4a   :  { %203 = vmatmul.mubr.f32.vlgmr.msra.gmra.mrb[0].mxu0 %v238_v33 }
 0x11d   :  { %v132_v34 = vpop.f32.mrb[0].mxu0 }
 0x11e   :  { %136 = vst [vmem:[#allocation7] sm:$0x1] %v132_v34  ;;  %v204_v35 = vpop.f32.mrb[1].mxu0 }
 0x11f   :  { %294 = shalt.err (!%p291_p6)
}
 0x120   :  { %s295_s17 = scalar_lea.hbm %s388_s3, 16 }
 0x121   :  { %p296_p7 = scmp.ne.s32.totalorder %s388_s3, %s295_s17  ;;  %p299_p8 = scmp.lt.u32.totalorder %s295_s17, %s388_s3 }
 0x123   :  { %p301_p9 = pnand %p299_p8, %p296_p7 }
 0x125   :  { %304 = shalt.err (!%p301_p9)
}
 0x126   :  { %146 = dma.vmem_to_hbm [thread:$0]  %s144_s12, 16, %s388_s3, [#allocation4]  }
 0x127   :  { %309 = dma.done.wait [#allocation4], 16  }
 0x128   :  { %310 = vsyncadd [#allocation4], 4294967280 }
 0x129   :  { %150 = vsyncpa [#allocation3], 1 }
 0x12a   :  { %151 = vsyncpa [#allocation6], 1 }
 0x12b   :  { %152 = vsyncpa [#allocation4], 1 }

</bundles_post_ra>
